<compile_context>
chip_gen: v7x
topology: tpu7x:2x2x1
jax: 0.10.0
libtpu: 0.0.40
codegen_flags: <defaults>
</compile_context>

<pallas_src>
import functools

import jax
import jax.numpy as jnp
from jax import lax
from jax.experimental import pallas as pl
from jax.experimental.pallas import tpu as pltpu

# Hyperparameters implied by the PyTorch module's (missing) module-level constants.
GNN_HIDDEN_CHANNELS = 32
GNN_NUM_LAYERS = 3
GNN_DROPOUT = 0.5  # eval-mode forward -> dropout is the identity


def _round_up(x, m):
    return ((x + m - 1) // m) * m


# ---------------------------------------------------------------------------
# Fused multi-layer GCN kernel
# ---------------------------------------------------------------------------
def _fused_gcn_kernel(a_ref, x_ref, w_ref, b_ref, o_ref, h_ref, *,
                      num_layers, num_classes):
    """grid = (layer l [outer], node row-tile i [inner]).

    a_ref : (tm, n_pad)       bf16 -- row tile i of the normalized adjacency Â
    x_ref : (n_pad, f_pad)    bf16 -- padded input features (resident, fetched once)
    w_ref : (f_pad, f_pad)    bf16 -- layer-l weight (leading layer dim squeezed)
    b_ref : (1, f_pad)        f32  -- layer-l bias
    o_ref : (tm, f_pad)       f32  -- output row tile (real values written on last layer)
    h_ref : (2, n_pad, f_pad) bf16 -- ping-pong whole-graph activation scratch
    """
    l = pl.program_id(0)
    i = pl.program_id(1)
    tm = a_ref.shape[0]

    # Seed the activation ping-pong buffer with the input features, exactly once.
    @pl.when((l == 0) & (i == 0))
    def _():
        h_ref[0] = x_ref[...]

    read_slot = lax.rem(l, 2)
    h_in = h_ref[read_slot]                              # (n_pad, f_pad) bf16

    # Aggregate-then-transform: (Â_tile @ H) @ W.  With features padded to 128 both
    # dots are lane-dense bf16 MXU matmuls with f32 accumulation, and H @ W is never
    # materialized for rows outside this tile.
    agg = jnp.dot(a_ref[...], h_in, preferred_element_type=jnp.float32)
    z = jnp.dot(agg.astype(jnp.bfloat16), w_ref[...],
                preferred_element_type=jnp.float32) + b_ref[...]       # (tm, f_pad) f32

    is_hidden = l < num_layers - 1
    hval = jnp.maximum(z, 0.0).astype(h_ref.dtype)       # ReLU (dropout = identity in eval)
    row0 = pl.multiple_of(i * tm, tm)

    # Hidden layers: write this row tile of the new activation into the *other* slot.
    # (Two static-index branches instead of one dynamic-index store.)
    @pl.when(is_hidden & (read_slot == 0))
    def _():
        h_ref[1, pl.ds(row0, tm), :] = hval

    @pl.when(is_hidden & (read_slot == 1))
    def _():
        h_ref[0, pl.ds(row0, tm), :] = hval

    # Last layer: masked, numerically stable log_softmax over the real classes only.
    @pl.when(l == num_layers - 1)
    def _():
        col = lax.broadcasted_iota(jnp.int32, z.shape, 1)
        logits = jnp.where(col < num_classes, z, jnp.float32(-1e30))
        m = jnp.max(logits, axis=1, keepdims=True)
        s = logits - m
        lse = jnp.log(jnp.sum(jnp.exp(s), axis=1, keepdims=True))
        o_ref[...] = (s - lse).astype(o_ref.dtype)


@functools.partial(jax.jit, static_argnames=("tm", "num_classes"))
def _fused_gcn_forward(a_pad, x_pad, w_stack, b_stack, *, tm, num_classes):
    n_pad = a_pad.shape[0]
    f_pad = x_pad.shape[1]
    num_layers = w_stack.shape[0]
    n_tiles = n_pad // tm

    kern = functools.partial(_fused_gcn_kernel,
                             num_layers=num_layers, num_classes=num_classes)
    return pl.pallas_call(
        kern,
        out_shape=jax.ShapeDtypeStruct((n_pad, f_pad), jnp.float32),
        grid_spec=pltpu.PrefetchScalarGridSpec(
            num_scalar_prefetch=0,
            grid=(num_layers, n_tiles),                   # layer outer, row tile inner
            in_specs=[
                pl.BlockSpec((tm, n_pad), lambda l, i: (i, 0)),              # Â row tile
                pl.BlockSpec((n_pad, f_pad), lambda l, i: (0, 0)),           # X (resident)
                pl.BlockSpec((None, f_pad, f_pad), lambda l, i: (l, 0, 0)),  # W_l
                pl.BlockSpec((None, 1, f_pad), lambda l, i: (l, 0, 0)),      # b_l
            ],
            out_specs=pl.BlockSpec((tm, f_pad), lambda l, i: (i, 0)),
            scratch_shapes=[pltpu.VMEM((2, n_pad, f_pad), jnp.bfloat16)],
        ),
        compiler_params=pltpu.CompilerParams(
            # Both axes carry dependencies (layer ordering + shared VMEM activation
            # scratch across row tiles), so neither may be megacore-"parallel".
            dimension_semantics=("arbitrary", "arbitrary"),
            vmem_limit_bytes=48 * 1024 * 1024,
        ),
    )(a_pad, x_pad, w_stack, b_stack)


# ---------------------------------------------------------------------------
# Plain-JAX glue: graph densification / padding / parameter packing
# ---------------------------------------------------------------------------
def build_normalized_adjacency(edge_index, num_nodes):
    """Dense Â = D^{-1/2}(A+I)D^{-1/2}, stored as Â[dst, src] so out = Â @ X aggregates.

    Matches PyG gcn_norm: duplicate edges accumulate (scatter-add) and self-loops are
    only added to nodes that do not already have one.
    """
    src, dst = edge_index[0], edge_index[1]
    a = jnp.zeros((num_nodes, num_nodes), jnp.float32).at[dst, src].add(1.0)
    diag = jnp.diagonal(a)
    a = a + jnp.diag(jnp.where(diag > 0.0, 0.0, 1.0))    # add only the *missing* self-loops
    deg = jnp.sum(a, axis=1)
    dinv = jnp.where(deg > 0.0, lax.rsqrt(deg), 0.0)
    return dinv[:, None] * a * dinv[None, :]
    # TODO(synk): for very large graphs, skip densification and aggregate via a
    # scalar-prefetch (PrefetchScalarGridSpec) gather over neighbor lists instead.


def prepare_graph(edge_index, num_nodes, num_features, num_classes, *, tile_rows=256):
    """One-time per-graph preparation (hoisted out of the forward pass)."""
    tm = min(tile_rows, _round_up(num_nodes, 16))        # multiple of 16 (bf16 sublane pack)
    n_pad = _round_up(num_nodes, tm)
    f_pad = _round_up(max(num_features, GNN_HIDDEN_CHANNELS, num_classes), 128)
    a_hat = build_normalized_adjacency(edge_index, num_nodes)
    a_pad = jnp.pad(a_hat, ((0, n_pad - num_nodes), (0, n_pad - num_nodes)))
    return {
        "a_pad": a_pad.astype(jnp.bfloat16),
        "tm": tm,
        "n_pad": n_pad,
        "f_pad": f_pad,
        "num_nodes": num_nodes,
        "num_classes": num_classes,
    }


def init_params(key, num_features, num_classes):
    dims = [num_features] + [GNN_HIDDEN_CHANNELS] * (GNN_NUM_LAYERS - 1) + [num_classes]
    params = []
    for i in range(GNN_NUM_LAYERS):
        f_in, f_out = dims[i], dims[i + 1]
        key, wk = jax.random.split(key)
        limit = jnp.sqrt(6.0 / (f_in + f_out))            # Glorot uniform (PyG GCNConv)
        w = jax.random.uniform(wk, (f_in, f_out), jnp.float32, -limit, limit)
        b = jnp.zeros((f_out,), jnp.float32)              # PyG GCNConv zero bias
        params.append((w, b))
    return params


def pack_params(params, f_pad):
    """One-time: zero-pad every (W, b) to (f_pad, f_pad) / (1, f_pad) and stack by layer."""
    num_layers = len(params)
    w_stack = jnp.zeros((num_layers, f_pad, f_pad), jnp.bfloat16)
    b_stack = jnp.zeros((num_layers, 1, f_pad), jnp.float32)
    for i, (w, b) in enumerate(params):
        f_in, f_out = w.shape
        w_stack = w_stack.at[i, :f_in, :f_out].set(w.astype(jnp.bfloat16))
        b_stack = b_stack.at[i, 0, :f_out].set(b.astype(jnp.float32))
    return w_stack, b_stack


def gnn_forward(x, graph, w_stack, b_stack):
    """Eval-mode GNNModel forward: fused GCN stack + log_softmax (single Pallas kernel)."""
    # TODO(synk): training-mode dropout (p=GNN_DROPOUT) is not implemented; eval-mode
    # forward treats it as the identity, matching module.eval() semantics.
    n, f_in = x.shape
    n_pad, f_pad = graph["n_pad"], graph["f_pad"]
    x_pad = jnp.pad(x.astype(jnp.bfloat16), ((0, n_pad - n), (0, f_pad - f_in)))
    out_pad = _fused_gcn_forward(graph["a_pad"], x_pad, w_stack, b_stack,
                                 tm=graph["tm"], num_classes=graph["num_classes"])
    return out_pad[:n, :graph["num_classes"]]


def _reference_forward(x, a_hat, params):
    """Pure-JAX f32 reference for correctness checking."""
    h = x
    for w, b in params[:-1]:
        h = jnp.maximum(a_hat @ (h @ w) + b[None, :], 0.0)
    w, b = params[-1]
    logits = a_hat @ (h @ w) + b[None, :]
    return jax.nn.log_softmax(logits, axis=1)


if __name__ == "__main__":
    key = jax.random.PRNGKey(0)
    num_nodes, num_features, num_classes, num_edges = 64, 16, 8, 128

    kx, ke, kp = jax.random.split(key, 3)
    x = jax.random.normal(kx, (num_nodes, num_features), jnp.float32)
    edge_index = jax.random.randint(ke, (2, num_edges), 0, num_nodes, dtype=jnp.int32)
    params = init_params(kp, num_features, num_classes)

    graph = prepare_graph(edge_index, num_nodes, num_features, num_classes)  # once / graph
    w_stack, b_stack = pack_params(params, graph["f_pad"])                   # once / model

    out = gnn_forward(x, graph, w_stack, b_stack)
    jax.block_until_ready(out)

    assert out.shape == (num_nodes, num_classes)
    # rows of log_softmax should sum (in prob space) to 1
    assert jnp.allclose(jnp.sum(jnp.exp(out), axis=1), 1.0, atol=1e-3)
    # match the pure-JAX f32 reference (kernel uses bf16 MXU inputs, f32 accumulation)
    ref = _reference_forward(x, build_normalized_adjacency(edge_index, num_nodes), params)
    err = float(jnp.max(jnp.abs(out - ref)))
    assert err < 0.1, f"max abs error vs reference: {err}"
    print("KERNEL_OK")
</pallas_src>

<mosaic_0001>
module attributes {stable_mosaic.version = 11 : i64} {
  func.func @_fused_gcn_kernel(%arg0: i32, %arg1: i32, %arg2: memref<64x64xbf16, #tpu.memory_space<vmem>>, %arg3: memref<64x128xbf16, #tpu.memory_space<vmem>>, %arg4: memref<1x128x128xbf16, #tpu.memory_space<vmem>>, %arg5: memref<1x1x128xf32, #tpu.memory_space<vmem>>, %arg6: memref<64x128xf32, #tpu.memory_space<vmem>>, %arg7: memref<2x64x128xbf16, #tpu.memory_space<vmem>>) attributes {dimension_semantics = [#tpu.dimension_semantics<arbitrary>, #tpu.dimension_semantics<arbitrary>], iteration_bounds = array<i64: 3, 1>, scalar_prefetch = 0 : i64, scratch_operands = 1 : i64, tpu.core_type = #tpu.core_type<tc>, window_params = [{transform_indices = @transform_0, window_bounds = array<i64: 64, 64>}, {pipeline_mode = #tpu.pipeline_mode<synchronous>, transform_indices = @transform_1, window_bounds = array<i64: 64, 128>}, {transform_indices = @transform_2, window_bounds = array<i64: 1, 128, 128>}, {transform_indices = @transform_3, window_bounds = array<i64: 1, 1, 128>}, {transform_indices = @transform_4, window_bounds = array<i64: 64, 128>}]} {
    %c0_i32 = arith.constant 0 : i32
    %0 = arith.cmpi eq, %arg0, %c0_i32 : i32
    %c0_i32_0 = arith.constant 0 : i32
    %1 = arith.cmpi eq, %arg1, %c0_i32_0 : i32
    %2 = arith.andi %0, %1 : i1
    %3 = arith.extui %2 : i1 to i32
    %c0_i32_1 = arith.constant 0 : i32
    %4 = arith.cmpi ne, %3, %c0_i32_1 : i32
    scf.if %4 {
      %c0_19 = arith.constant 0 : index
      %c0_20 = arith.constant 0 : index
      %36 = vector.load %arg3[%c0_19, %c0_20] : memref<64x128xbf16, #tpu.memory_space<vmem>>, vector<64x128xbf16>
      %c0_21 = arith.constant 0 : index
      %c0_22 = arith.constant 0 : index
      %c0_23 = arith.constant 0 : index
      %37 = vector.load %arg7[%c0_21, %c0_22, %c0_23] : memref<2x64x128xbf16, #tpu.memory_space<vmem>>, vector<1x64x128xbf16>
      %38 = vector.shape_cast %37 : vector<1x64x128xbf16> to vector<64x128xbf16>
      %39 = vector.shape_cast %36 : vector<64x128xbf16> to vector<1x64x128xbf16>
      tpu.vector_store %arg7[%c0_21, %c0_22, %c0_23], %39 {strides = array<i32>} : memref<2x64x128xbf16, #tpu.memory_space<vmem>>, vector<1x64x128xbf16>,
    } else {
    }
    %c2_i32 = arith.constant 2 : i32
    %5 = arith.remsi %arg0, %c2_i32 : i32
    %6 = arith.index_cast %5 : i32 to index
    %c0 = arith.constant 0 : index
    %c0_2 = arith.constant 0 : index
    %7 = vector.load %arg7[%6, %c0, %c0_2] : memref<2x64x128xbf16, #tpu.memory_space<vmem>>, vector<1x64x128xbf16>
    %8 = vector.shape_cast %7 : vector<1x64x128xbf16> to vector<64x128xbf16>
    %c0_3 = arith.constant 0 : index
    %c0_4 = arith.constant 0 : index
    %9 = vector.load %arg2[%c0_3, %c0_4] : memref<64x64xbf16, #tpu.memory_space<vmem>>, vector<64x64xbf16>
    %cst = arith.constant dense<0.000000e+00> : vector<64x128xf32>
    %10 = tpu.matmul %9, %8, %cst {dimension_numbers = #tpu.dot_dimension_numbers<[1], [0], [0], [1], [0, 0, 1, 1], [], []>} : vector<64x64xbf16>, vector<64x128xbf16>, vector<64x128xf32> -> vector<64x128xf32>
    %11 = arith.truncf %10 : vector<64x128xf32> to vector<64x128xbf16>
    %c0_5 = arith.constant 0 : index
    %c0_6 = arith.constant 0 : index
    %c0_7 = arith.constant 0 : index
    %12 = vector.load %arg4[%c0_5, %c0_6, %c0_7] : memref<1x128x128xbf16, #tpu.memory_space<vmem>>, vector<1x128x128xbf16>
    %13 = vector.shape_cast %12 : vector<1x128x128xbf16> to vector<128x128xbf16>
    %cst_8 = arith.constant dense<0.000000e+00> : vector<64x128xf32>
    %14 = tpu.matmul %11, %13, %cst_8 {dimension_numbers = #tpu.dot_dimension_numbers<[1], [0], [0], [1], [0, 0, 1, 1], [], []>} : vector<64x128xbf16>, vector<128x128xbf16>, vector<64x128xf32> -> vector<64x128xf32>
    %c0_9 = arith.constant 0 : index
    %c0_10 = arith.constant 0 : index
    %c0_11 = arith.constant 0 : index
    %15 = vector.load %arg5[%c0_9, %c0_10, %c0_11] : memref<1x1x128xf32, #tpu.memory_space<vmem>>, vector<1x1x128xf32>
    %16 = vector.shape_cast %15 : vector<1x1x128xf32> to vector<1x128xf32>
    %17 = vector.broadcast %16 : vector<1x128xf32> to vector<64x128xf32>
    %18 = arith.addf %14, %17 : vector<64x128xf32>
    %c2_i32_12 = arith.constant 2 : i32
    %19 = arith.cmpi slt, %arg0, %c2_i32_12 : i32
    %cst_13 = arith.constant 0.000000e+00 : f32
    %20 = vector.broadcast %cst_13 : f32 to vector<64x128xf32>
    %21 = arith.maximumf %18, %20 : vector<64x128xf32>
    %22 = arith.truncf %21 : vector<64x128xf32> to vector<64x128xbf16>
    %c64_i32 = arith.constant 64 : i32
    %23 = arith.muli %arg1, %c64_i32 : i32
    %24 = tpu.assume_multiple %23, 64 : i32
    %c0_i32_14 = arith.constant 0 : i32
    %25 = arith.cmpi eq, %5, %c0_i32_14 : i32
    %26 = arith.andi %19, %25 : i1
    %27 = arith.extui %26 : i1 to i32
    %c0_i32_15 = arith.constant 0 : i32
    %28 = arith.cmpi ne, %27, %c0_i32_15 : i32
    scf.if %28 {
      %c1 = arith.constant 1 : index
      %36 = arith.index_cast %24 : i32 to index
      %c0_19 = arith.constant 0 : index
      %37 = vector.load %arg7[%c1, %36, %c0_19] : memref<2x64x128xbf16, #tpu.memory_space<vmem>>, vector<1x64x128xbf16>
      %38 = vector.shape_cast %37 : vector<1x64x128xbf16> to vector<64x128xbf16>
      %39 = vector.shape_cast %22 : vector<64x128xbf16> to vector<1x64x128xbf16>
      tpu.vector_store %arg7[%c1, %36, %c0_19], %39 {strides = array<i32>} : memref<2x64x128xbf16, #tpu.memory_space<vmem>>, vector<1x64x128xbf16>,
    } else {
    }
    %c1_i32 = arith.constant 1 : i32
    %29 = arith.cmpi eq, %5, %c1_i32 : i32
    %30 = arith.andi %19, %29 : i1
    %31 = arith.extui %30 : i1 to i32
    %c0_i32_16 = arith.constant 0 : i32
    %32 = arith.cmpi ne, %31, %c0_i32_16 : i32
    scf.if %32 {
      %c0_19 = arith.constant 0 : index
      %36 = arith.index_cast %24 : i32 to index
      %c0_20 = arith.constant 0 : index
      %37 = vector.load %arg7[%c0_19, %36, %c0_20] : memref<2x64x128xbf16, #tpu.memory_space<vmem>>, vector<1x64x128xbf16>
      %38 = vector.shape_cast %37 : vector<1x64x128xbf16> to vector<64x128xbf16>
      %39 = vector.shape_cast %22 : vector<64x128xbf16> to vector<1x64x128xbf16>
      tpu.vector_store %arg7[%c0_19, %36, %c0_20], %39 {strides = array<i32>} : memref<2x64x128xbf16, #tpu.memory_space<vmem>>, vector<1x64x128xbf16>,
    } else {
    }
    %c2_i32_17 = arith.constant 2 : i32
    %33 = arith.cmpi eq, %arg0, %c2_i32_17 : i32
    %34 = arith.extui %33 : i1 to i32
    %c0_i32_18 = arith.constant 0 : i32
    %35 = arith.cmpi ne, %34, %c0_i32_18 : i32
    scf.if %35 {
      %36 = tpu.iota {dimensions = array<i32: 1>} : vector<64x128xi32>
      %c8_i32 = arith.constant 8 : i32
      %37 = vector.broadcast %c8_i32 : i32 to vector<64x128xi32>
      %38 = arith.cmpi slt, %36, %37 : vector<64x128xi32>
      %cst_19 = arith.constant -1.000000e+30 : f32
      %39 = vector.broadcast %cst_19 : f32 to vector<64x128xf32>
      %40 = arith.select %38, %18, %39 : vector<64x128xi1>, vector<64x128xf32>
      %cst_20 = arith.constant dense<0xFF800000> : vector<64xf32>
      %41 = vector.multi_reduction <maximumf>, %40, %cst_20 [1] : vector<64x128xf32> to vector<64xf32>
      %42 = vector.shape_cast %41 : vector<64xf32> to vector<64x1xf32>
      %43 = vector.broadcast %42 : vector<64x1xf32> to vector<64x128xf32>
      %44 = arith.subf %40, %43 : vector<64x128xf32>
      %45 = math.exp %44 : vector<64x128xf32>
      %cst_21 = arith.constant dense<0.000000e+00> : vector<64xf32>
      %46 = vector.multi_reduction <add>, %45, %cst_21 [1] : vector<64x128xf32> to vector<64xf32>
      %47 = vector.shape_cast %46 : vector<64xf32> to vector<64x1xf32>
      %48 = math.log %47 : vector<64x1xf32>
      %49 = vector.broadcast %48 : vector<64x1xf32> to vector<64x128xf32>
      %50 = arith.subf %44, %49 : vector<64x128xf32>
      %c0_22 = arith.constant 0 : index
      %c0_23 = arith.constant 0 : index
      %51 = vector.load %arg6[%c0_22, %c0_23] : memref<64x128xf32, #tpu.memory_space<vmem>>, vector<64x128xf32>
      tpu.vector_store %arg6[%c0_22, %c0_23], %50 {strides = array<i32>} : memref<64x128xf32, #tpu.memory_space<vmem>>, vector<64x128xf32>,
    } else {
    }
    return
  }
  func.func @transform_0(%arg0: i32, %arg1: i32) -> (i32, i32) {
    %c0_i32 = arith.constant 0 : i32
    %c0_i32_0 = arith.constant 0 : i32
    return %arg1, %c0_i32 : i32, i32
  }
  func.func @transform_1(%arg0: i32, %arg1: i32) -> (i32, i32) {
    %c0_i32 = arith.constant 0 : i32
    %c0_i32_0 = arith.constant 0 : i32
    %c0_i32_1 = arith.constant 0 : i32
    return %c0_i32, %c0_i32_0 : i32, i32
  }
  func.func @transform_2(%arg0: i32, %arg1: i32) -> (i32, i32, i32) {
    %c0_i32 = arith.constant 0 : i32
    %c0_i32_0 = arith.constant 0 : i32
    %c0_i32_1 = arith.constant 0 : i32
    return %arg0, %c0_i32, %c0_i32_0 : i32, i32, i32
  }
  func.func @transform_3(%arg0: i32, %arg1: i32) -> (i32, i32, i32) {
    %c0_i32 = arith.constant 0 : i32
    %c0_i32_0 = arith.constant 0 : i32
    %c0_i32_1 = arith.constant 0 : i32
    return %arg0, %c0_i32, %c0_i32_0 : i32, i32, i32
  }
  func.func @transform_4(%arg0: i32, %arg1: i32) -> (i32, i32) {
    %c0_i32 = arith.constant 0 : i32
    %c0_i32_0 = arith.constant 0 : i32
    return %arg1, %c0_i32 : i32, i32
  }
}

</mosaic_0001>

<bundles_post_ra>
// kernel: _fused_gcn_forward.1
= control target key start
LH: loop header
LB: loop body
LE: loop exit
PB: predicated region body
PF: predicated region fallthrough
CT: control target
= control target key end

     0   :  { %9 = vsyncpa [#allocation4], 0  ;;  %s1578_s0 = inlined_call_operand.hbm [shape: bf16[64,64], index: 0, kind: input, shape index: {}]   ;;  %s1579_s1 = inlined_call_operand.hbm [shape: bf16[64,128], index: 1, kind: input, shape index: {}]   ;;  %s1580_s2 = inlined_call_operand.hbm [shape: bf16[3,128,128], index: 2, kind: input, shape index: {}]   ;;  %s1581_s3 = inlined_call_operand.vmem [shape: f32[3,1,128], index: 3, kind: input, shape index: {}]   ;;  %s1582_s4 = inlined_call_operand.hbm [shape: f32[64,128], index: 4, kind: output, shape index: {}]  }
   0x1   :  { %10 = vsyncpa [#allocation7], 0 }
   0x2   :  { %11 = vsyncpa [#allocation5], 0  ;;  %s1281_s15 = smov 0   ;;  %s1283_s16 = smov 0  }
   0x3   :  { %s1285_s17 = smov 0   ;;  %s1287_s18 = smov 0  }
   0x4   :  { %s1289_s19 = smov 0   ;;  %s1291_s20 = smov 0  }
   0x5 LB: > { %s1310_s21 = sadd.s32 4294967295, %s1246_s20   ;;  %p90_p0 = scmp.ne.s32.totalorder %s1234_s17, %s1230_s16  ;;  %s1246_s20 = sphi %s1291_s20, %s17_s20   ;;  %s1242_s19 = sphi %s1289_s19, %s1603_s19   ;;  %s1238_s18 = sphi %s1287_s18, %s1602_s18   ;;  %s1234_s17 = sphi %s1285_s17, %s1601_s17   ;;  %s1230_s16 = sphi %s1283_s16, %s1600_s16   ;;  %s1226_s15 = sphi %s1281_s15, %s1599_s15  }
   0x6   : > { %p91_p1 = scmp.eq.s32.totalorder %s1246_s20, 0  ;;  %p96_p2 = scmp.ne.s32.totalorder %s1230_s16, %s1226_s15 }
   0x7   : > { %p1583_p3 = scmp.eq.s32.totalorder %s1310_s21, 0  ;;  %p829_p4 = scmp.ge.s32.totalorder %s1246_s20, 1 }
   0x8   : > { %p92_p5 = por %p91_p1, %p90_p0  ;;  %p159_p6 = scmp.lt.s32.totalorder %s1246_s20, 4 }
   0x9   : > { %p1321_p7 = por %p1583_p3, %p96_p2  ;;  %s1248_s24 = smov [#allocation3]  }
   0xa   : > { %p1325_p8 = pnand %p829_p4, %p159_p6  ;;  %s174_s25 = sshll.u32 %s1248_s24, 4  ;;  %s175_s25 = int_to_ptr.vmem [resolvable:$true] %s174_s25 }
   0xb   : > { %s1587_s22 = scalar_select %p1321_p7, 1, 0 }
   0xc   : > { %s1588_s23 = scalar_select %p1325_p8, 1, 0 }
   0xd   : > { %p951_p9 = pneg %p1325_p8  ;;  %p964_p11 = scmp.lt.s32.totalorder %s1246_s20, 3 }
   0xe   : > { %s1072_s30 = scalar_lea.hbm %s1578_s0, 512 }
   0xf   : > { %p1333_p10 = pnand %p951_p9, %p1583_p3  ;;  %p1338_p12 = pnand %p964_p11, %p92_p5 }
  0x10   : > { %p1073_p13 = scmp.ne.s32.totalorder %s1578_s0, %s1072_s30  ;;  %p1079_p4 = scmp.lt.u32.totalorder %s1072_s30, %s1578_s0 }
  0x11   : > { %s1590_s27 = scalar_select %p1338_p12, 1, 0 }
  0x12   : > { %p1074_p0 = pneg %p1333_p10 }
  0x14   : > { %p1075_p1 = pnand %p1074_p0, %p1073_p13 }
  0x16   : > { %p1076_p2 = pneg %p1075_p1 }
  0x18   : > { %p1081_p5 = pnand %p1079_p4, %p1076_p2 }
  0x1a   : > { %1084 = shalt.err (!%p1081_p5)
}
  0x1b   : > { %s1085_s9 = scalar_lea.vmem %s175_s25, 512  ;;  %p1093_p3 = scmp.lt.s32.totalorder %s175_s25, %s175_s25 }
  0x1c   : > { %p1086_p6 = scmp.ne.s32.totalorder %s175_s25, %s1085_s9  ;;  %p1094_p7 = scmp.lt.s32.totalorder %s1085_s9, %s1085_s9 }
  0x1e   : > { %p1088_p9 = pnand %p1086_p6, %p1074_p0  ;;  %p1095_p8 = por %p1094_p7, %p1093_p3 }
  0x20   : > { %p1089_p11 = pneg %p1088_p9 }
  0x22   : > { %p1096_p12 = pnand %p1095_p8, %p1089_p11 }
  0x24   : > { %1099 = shalt.err (!%p1096_p12)
}
  0x25   : > { %s1249_s10 = smov 64   ;;  %s1250_s11 = smov 4  }
  0x26   : > { %954 = dma.hbm_to_vmem [thread:$0]  (!%p1333_p10), %s1578_s0, 512, %s175_s25, [#allocation4], %s1249_s10, %s1249_s10, %s1250_s11  }
  0x27   : > { %s1251_s14 = smov [#allocation6]   ;;  %s1100_s29 = scalar_lea.hbm %s1579_s1, 512 }
  0x28   : > { %s187_s15 = sshll.u32 %s1251_s14, 4  ;;  %p1101_p3 = scmp.ne.s32.totalorder %s1579_s1, %s1100_s29  ;;  %s188_s15 = int_to_ptr.vmem [resolvable:$true] %s187_s15 }
  0x29   : > { %p1107_p12 = scmp.lt.u32.totalorder %s1100_s29, %s1579_s1 }
  0x2a   : > { %p1103_p7 = pnand %p1101_p3, %p1074_p0 }
  0x2c   : > { %p1104_p8 = pneg %p1103_p7 }
  0x2e   : > { %p1109_p13 = pnand %p1107_p12, %p1104_p8 }
  0x30   : > { %1112 = shalt.err (!%p1109_p13)
}
  0x31   : > { %s1113_s25 = scalar_lea.vmem %s188_s15, 512  ;;  %p1121_p5 = scmp.lt.s32.totalorder %s188_s15, %s188_s15 }
  0x32   : > { %p1114_p1 = scmp.ne.s32.totalorder %s188_s15, %s1113_s25  ;;  %p1122_p6 = scmp.lt.s32.totalorder %s1113_s25, %s1113_s25 }
  0x34   : > { %p1116_p2 = pnand %p1114_p1, %p1074_p0  ;;  %p1123_p9 = por %p1122_p6, %p1121_p5 }
  0x36   : > { %p1117_p4 = pneg %p1116_p2 }
  0x38   : > { %p1124_p11 = pnand %p1123_p9, %p1117_p4 }
  0x3a   : > { %1127 = shalt.err (!%p1124_p11)
}
  0x3b   : > { %957 = dma.hbm_to_vmem [thread:$0]  (!%p1333_p10), %s1579_s1, 512, %s188_s15, [#allocation7], %s1249_s10, %s1249_s10, %s1250_s11  }
  0x3c   : > { %s29_s12 = sadd.s32 1, %s1242_s19  ;;  %s83_s13 = sadd.s32 1, %s1234_s17 }
  0x3d   : > { %p31_p0 = scmp.ge.s32.totalorder %s29_s12, 3  ;;  %s201_s14 = sand.u32 1, %s1246_s20  }
  0x3e   : > { %s203_s26 = sand.u32 1, %s1234_s17   ;;  %s874_s28 = sshll.u32 %s1242_s19, 10 }
  0x3f   : > { %s1605_s12 = smov (%p31_p0, %s29_s12), 0  ;;  %s833_s24 = sshll.u32 %s203_s26, 6 }
  0x40   : > { %s80_s29 = ssub.s32 %s1242_s19, %s1605_s12  ;;  %s1402_s6 = scalar_lea.hbm %s1580_s2, %s874_s28 }
  0x41   : > { %p81_p3 = scmp.eq.s32.totalorder %s80_s29, 0  ;;  %s205_s15 = scalar_lea.vmem [#allocation8], %s833_s24 }
  0x42   : > { %s212_s7 = sshll.u32 %s205_s15, 4  ;;  %s1409_s8 = scalar_lea.sflag [#allocation4], %s201_s14  ;;  %s1407_s7 = int_to_ptr.vmem [resolvable:$true] %s212_s7 }
  0x43   : > { %s1405_s25 = scalar_select %p81_p3, %s1234_s17, %s83_s13  }
  0x44   : > { %s1128_s9 = scalar_lea.hbm %s1402_s6, 1024  ;;  %p1591_p7 = scmp.ne.s32.totalorder %s1590_s27, 0 }
  0x45   : > { %p1129_p10 = scmp.ne.s32.totalorder %s1402_s6, %s1128_s9  ;;  %s1133_s29 = scalar_lea.hbm %s1580_s2, 3072 }
  0x46   : > { %p1130_p8 = pneg %p1591_p7  ;;  %p1134_p1 = scmp.lt.u32.totalorder %s1402_s6, %s1580_s2 }
  0x47   : > { %p1135_p2 = scmp.lt.u32.totalorder %s1133_s29, %s1128_s9  ;;  %p1137_p5 = scmp.lt.u32.totalorder %s1128_s9, %s1402_s6 }
  0x48   : > { %p1131_p12 = pnand %p1130_p8, %p1129_p10 }
  0x49   : > { %p1136_p4 = por %p1135_p2, %p1134_p1 }
  0x4a   : > { %p1132_p13 = pneg %p1131_p12 }
  0x4b   : > { %p1138_p6 = por %p1137_p5, %p1136_p4 }
  0x4d   : > { %p1139_p9 = pnand %p1138_p6, %p1132_p13 }
  0x4f   : > { %1142 = shalt.err (!%p1139_p9)
}
  0x50   : > { %s1143_s13 = scalar_lea.vmem %s1407_s7, 1024  ;;  %s1252_s14 = smov [#allocation8]  }
  0x51   : > { %p1144_p11 = scmp.ne.s32.totalorder %s1407_s7, %s1143_s13  ;;  %s1148_s5 = sshll.u32 %s1252_s14, 4  ;;  %s1149_s5 = int_to_ptr.vmem [resolvable:$false] %s1148_s5 }
  0x52   : > { %s1150_s15 = scalar_lea.vmem %s1149_s5, 2048  ;;  %p1151_p10 = scmp.lt.s32.totalorder %s1407_s7, %s1149_s5 }
  0x53   : > { %p1146_p0 = pnand %p1144_p11, %p1130_p8  ;;  %p1152_p12 = scmp.lt.s32.totalorder %s1150_s15, %s1143_s13 }
  0x55   : > { %p1147_p3 = pneg %p1146_p0  ;;  %p1153_p1 = por %p1152_p12, %p1151_p10 }
  0x57   : > { %p1154_p2 = pnand %p1153_p1, %p1147_p3 }
  0x59   : > { %1157 = shalt.err (!%p1154_p2)
}
  0x5a   : > { %961 = dma.hbm_to_vmem [thread:$0]  (!%p1591_p7), %s1402_s6, 1024, %s1407_s7, %s1409_s8, %s1249_s10, %s1249_s10, %s1250_s11  }
  0x5b   : > { %p1592_p8 = scmp.ne.s32.totalorder %s1588_s23, 0 }
  0x5c   : > { %p1593_p13 = scmp.eq.s32.totalorder (!%p1592_p8), %s1310_s21, 0 }
  0x5d   : > { %230 = sbr.rel (%p1592_p8) target bundleno = 967 (0x3c7), region = 36 }
  0x64   : > { %1209 = dma.done.wait (%p1593_p13), [#allocation4], 512   ;;  %p1594_p4 = pmov %p1593_p13 }
  0x66   : > { %1211 = vsyncadd (%p1594_p4), [#allocation4], 4294966784  ;;  %p1595_p5 = pmov %p1594_p4 }
  0x67   : > { %p1596_p6 = pmov %p1594_p4 }
  0x68   : > { %1213 = dma.done.wait (%p1595_p5), [#allocation7], 512  }
  0x69   : > { %1215 = vsyncadd (%p1596_p6), [#allocation7], 4294966784  ;;  %s240_s27 = sand.u32 1, %s1310_s21   ;;  %s242_s10 = sand.u32 1, %s1230_s16  }
  0x6a   : > { %s839_s11 = sshll.u32 %s242_s10, 6  ;;  %s241_s23 = scalar_lea.sflag [#allocation4], %s240_s27 }
  0x6b   : > { %s1452_s6 = scalar_lea.vmem [#allocation8], %s839_s11  ;;  %p1597_p7 = scmp.ne.s32.totalorder %s1587_s22, 0 }
  0x6d   : > { %1217 = dma.done.wait (%p1597_p7), %s241_s23, 1024  }
  0x6e   : > { %1219 = vsyncadd (%p1597_p7), %s241_s23, 4294966272  ;;  %p268_p9 = scmp.lt.s32.totalorder %s1238_s18, 2  ;;  %p273_p11 = scmp.eq.s32.totalorder %s1238_s18, 0 }
  0x6f   : > { %v1024_v0 = vld [vmem:[#allocation6] sm:$0xff] (%p273_p11)   ;;  %v1025_v1 = vld [vmem:[#allocation6 + $0x8] sm:$0xff] (%p273_p11)   ;;  %v1026_v2 = vld [vmem:[#allocation6 + $0x10] sm:$0xff] (%p273_p11)  }
  0x70   : > { %s1463_s7 = scalar_select %p268_p9, %s1238_s18, 2 }
  0x71   : > { %278 = sbr.rel (!%p273_p11) target bundleno = 120 (0x78), region = 52  ;;  %311 = vst [vmem:[#allocation2] sm:$0xff] (%p273_p11), %v1024_v0  ;;  %312 = vst [vmem:[#allocation2 + $0x8] sm:$0xff] (%p273_p11), %v1025_v1  ;;  %v1027_v3 = vld [vmem:[#allocation6 + $0x18] sm:$0xff] (%p273_p11)  }
  0x72   : > { %s270_s26 = scalar_lea.vmem %s1581_s3, %s1463_s7  ;;  %313 = vst [vmem:[#allocation2 + $0x10] sm:$0xff] (%p273_p11), %v1026_v2  ;;  %314 = vst [vmem:[#allocation2 + $0x18] sm:$0xff] (%p273_p11), %v1027_v3 }
  0x78 PF: > { %p315_p0 = scmp.lt.s32.totalorder %s1238_s18, 0  ;;  %s316_s22 = ssub.s32 0, %s1238_s18  ;;  %v1028_v4 = vld [vmem:[#allocation3] sm:$0xff]   ;;  %vm356_vm0 = vcmask 523264   ;;  %v1033_v6 = vld [vmem:[%s1452_s6 + $0x8] sm:$0xff]   ;;  %v1034_v9 = vld [vmem:[%s1452_s6 + $0x10] sm:$0xff]  }
  0x79   : > { %s845_s28 = smin.u32 %s1238_s18, %s316_s22  ;;  %905 = vmatprep.mubr.msk.bf16.mxu0 %vm356_vm0, %v1028_v4  ;;  %v1032_v5 = vld [vmem:[%s1452_s6] sm:$0xff]   ;;  %v1035_v11 = vld [vmem:[%s1452_s6 + $0x18] sm:$0xff]   ;;  %v1029_v14 = vld [vmem:[#allocation3 + $0x8] sm:$0xff]  }
  0x7a   : > { %s318_s29 = sand.u32 1, %s845_s28   ;;  %913 = vmatprep.subr.bf16.mxu1 %v1032_v5  ;;  %v1036_v13 = vld [vmem:[%s1452_s6 + $0x20] sm:$0xff]   ;;  %v1037_v15 = vld [vmem:[%s1452_s6 + $0x28] sm:$0xff]   ;;  %v1030_v16 = vld [vmem:[#allocation3 + $0x10] sm:$0xff]  }
  0x7b   : > { %s319_s24 = ssub.s32 0, %s318_s29  ;;  %914 = vmatpush3.bf16.msra.mxu1 %v1032_v5  ;;  %v1038_v17 = vld [vmem:[%s1452_s6 + $0x30] sm:$0xff]   ;;  %v1031_v18 = vld [vmem:[#allocation3 + $0x18] sm:$0xff]   ;;  %v856_v32 = vld [vmem:[%s270_s26] ss:$0 sm:$0xff] }
  0x7c   : > { %s1607_s24 = smov (!%p315_p0, %s319_s24), %s318_s29  ;;  %915 = vmatprep.subr.bf16.mxu1 %v1033_v6  ;;  %v1039_v19 = vld [vmem:[%s1452_s6 + $0x38] sm:$0xff]  }
  0x7d   : > { %s876_s30 = sshll.u32 %s1607_s24, 5  ;;  %p588_p3 = scmp.eq.s32.totalorder %s1607_s24, 0 }
  0x7e   : > { %s323_s13 = scalar_lea.vmem [#allocation2], %s876_s30 }
  0x7f   : > { %v324_v7 = vld [vmem:[%s323_s13] sm:$0xff]  ;;  %p1481_p10 = pnand %p588_p3, %p268_p9  ;;  %v325_v8 = vld [vmem:[%s323_s13 + $0x8] sm:$0xff]  ;;  %v326_v10 = vld [vmem:[%s323_s13 + $0x10] sm:$0xff]  ;;  %916 = vmatpush3.bf16.msra.mxu1 %v1033_v6 }
  0x80   : > { %897 = vmatprep.subr.bf16.mxu0 %v324_v7  ;;  %917 = vmatprep.subr.bf16.mxu1 %v1034_v9  ;;  %v327_v12 = vld [vmem:[%s323_s13 + $0x18] sm:$0xff] }
  0x81   : > { %898 = vmatpush3.bf16.msra.mxu0 %v324_v7 }
  0x82   : > { %899 = vmatprep.subr.bf16.mxu0 %v325_v8 }
  0x83   : > { %918 = vmatpush3.bf16.msra.mxu1 %v1034_v9 }
  0x84   : > { %919 = vmatprep.subr.bf16.mxu1 %v1035_v11 }
  0x85   : > { %900 = vmatpush3.bf16.msra.mxu0 %v325_v8 }
  0x86   : > { %901 = vmatprep.subr.bf16.mxu0 %v326_v10 }
  0x87   : > { %920 = vmatpush3.bf16.msra.mxu1 %v1035_v11 }
  0x88   : > { %921 = vmatprep.subr.bf16.mxu1 %v1036_v13 }
  0x89   : > { %902 = vmatpush3.bf16.msra.mxu0 %v326_v10 }
  0x8a   : > { %903 = vmatprep.subr.bf16.mxu0 %v327_v12 }
  0x8b   : > { %922 = vmatpush3.bf16.msra.mxu1 %v1036_v13 }
  0x8c   : > { %923 = vmatprep.subr.bf16.mxu1 %v1037_v15 }
  0x8d   : > { %904 = vmatpush3.bf16.msra.mxu0 %v327_v12 }
  0x8f   : > { %924 = vmatpush3.bf16.msra.mxu1 %v1037_v15 }
  0x90   : > { %906 = vmatmul.mubr.msk.bf16.vlgmr.msra.gmra.mrb[0].mxu0 %vm356_vm0, %v1029_v14  ;;  %925 = vmatprep.subr.bf16.mxu1 %v1038_v17 }
  0x91   : > { %909 = vmatprep.mubr.msk.bf16.mxu0 %vm356_vm0, %v1030_v16 }
  0x93   : > { %926 = vmatpush3.bf16.msra.mxu1 %v1038_v17 }
  0x94   : > { %927 = vmatprep.subr.bf16.mxu1 %v1039_v19 }
  0x97   : > { %928 = vmatpush3.bf16.msra.mxu1 %v1039_v19 }
  0x98   : > { %910 = vmatmul.mubr.msk.bf16.gmra.mrb[4].mxu0 %vm356_vm0, %v1031_v18 }
 0x163   : > { %v907_v20 = vpop.f32.mrb[0].mxu0 }
 0x164   : > { %v403_v21 = vpop.f32.mrb[1].mxu0 }
 0x165   : > { %v908_v22 = vpop.f32.mrb[2].mxu0 }
 0x166   : > { %v435_v23 = vpack.c.bf16 %v908_v22, %v907_v20  ;;  %v406_v24 = vpop.f32.mrb[3].mxu0 }
 0x167   : > { %v434_v25 = vpack.c.bf16 %v406_v24, %v403_v21 }
 0x169   : > { %929 = vmatprep.mubr.bf16.mxu1 %v434_v25 }
 0x16a   : > { %930 = vmatmul.mubr.bf16.vlgmr.msra.gmra.mrb[0].mxu1 %v435_v23 }
 0x16b   : > { %v911_v26 = vpop.f32.mrb[4].mxu0 }
 0x16c   : > { %v419_v27 = vpop.f32.mrb[5].mxu0 }
 0x16d   : > { %v912_v28 = vpop.f32.mrb[6].mxu0 }
 0x16e   : > { %v437_v29 = vpack.c.bf16 %v912_v28, %v911_v26  ;;  %v422_v30 = vpop.f32.mrb[7].mxu0 }
 0x16f   : > { %v436_v31 = vpack.c.bf16 %v422_v30, %v419_v27 }
 0x171   : > { %933 = vmatprep.mubr.bf16.mxu1 %v436_v31 }
 0x172   : > { %934 = vmatmul.mubr.bf16.gmra.mrb[4].mxu1 %v437_v29 }
 0x23d   : > { %v931_v33 = vpop.f32.mrb[0].mxu1 }
 0x23e   : > { %v552_v34 = vadd.f32 %v931_v33, %v856_v32  ;;  %v543_v35 = vpop.f32.mrb[1].mxu1 }
 0x23f   : > { %v544_v36 = vadd.f32 %v856_v32, %v543_v35  ;;  %v932_v37 = vpop.f32.mrb[2].mxu1 }
 0x240   : > { %v555_v38 = vadd.f32 %v932_v37, %v856_v32  ;;  %v546_v39 = vpop.f32.mrb[3].mxu1  ;;  %v577_v41 = vmax.f32 %v552_v34, 0.0 }
 0x241   : > { %v547_v40 = vadd.f32 %v856_v32, %v546_v39  ;;  %v575_v43 = vmax.f32 %v544_v36, 0.0 }
 0x242   : > { %v578_v42 = vmax.f32 %v555_v38, 0.0 }
 0x243   : > { %v576_v44 = vmax.f32 %v547_v40, 0.0 }
 0x244   : > { %v584_v45 = vpack.c.bf16 %v578_v42, %v577_v41 }
 0x245   : > { %v583_v46 = vpack.c.bf16 %v576_v44, %v575_v43  ;;  %v935_v47 = vpop.f32.mrb[4].mxu1 }
 0x246   : > { %v568_v48 = vadd.f32 %v935_v47, %v856_v32  ;;  %v559_v49 = vpop.f32.mrb[5].mxu1  ;;  %866 = vst [vmem:[#allocation2 + $0x28] sm:$0xff] (!%p1481_p10), %v584_v45 }
 0x247   : > { %v560_v50 = vadd.f32 %v856_v32, %v559_v49  ;;  %v936_v51 = vpop.f32.mrb[6].mxu1  ;;  %592 = sbr.rel (%p1481_p10) target bundleno = 592 (0x250), region = 56  ;;  %865 = vst [vmem:[#allocation2 + $0x20] sm:$0xff] (!%p1481_p10), %v583_v46 }
 0x248   : > { %v571_v52 = vadd.f32 %v936_v51, %v856_v32  ;;  %v562_v53 = vpop.f32.mrb[7].mxu1  ;;  %v581_v55 = vmax.f32 %v568_v48, 0.0 }
 0x249   : > { %v563_v54 = vadd.f32 %v856_v32, %v562_v53  ;;  %v579_v57 = vmax.f32 %v560_v50, 0.0 }
 0x24a   : > { %v582_v56 = vmax.f32 %v571_v52, 0.0 }
 0x24b   : > { %v580_v58 = vmax.f32 %v563_v54, 0.0 }
 0x24c   : > { %v586_v59 = vpack.c.bf16 %v582_v56, %v581_v55 }
 0x24d   : > { %v585_v60 = vpack.c.bf16 %v580_v58, %v579_v57 }
 0x24e   : > { %868 = vst [vmem:[#allocation2 + $0x38] sm:$0xff] %v586_v59 }
 0x24f   : > { %867 = vst [vmem:[#allocation2 + $0x30] sm:$0xff] %v585_v60 }
 0x250 PF: > { %p602_p12 = scmp.eq.s32.totalorder %s1607_s24, 1 }
 0x252   : > { %p603_p1 = pnand %p602_p12, %p268_p9 }
 0x253   : > { %611 = vst [vmem:[#allocation2] sm:$0xff] (!%p603_p1), %v583_v46  ;;  %612 = vst [vmem:[#allocation2 + $0x8] sm:$0xff] (!%p603_p1), %v584_v45 }
 0x254   : > { %606 = sbr.rel (%p603_p1) target bundleno = 603 (0x25b), region = 60  ;;  %613 = vst [vmem:[#allocation2 + $0x10] sm:$0xff] (!%p603_p1), %v585_v60  ;;  %614 = vst [vmem:[#allocation2 + $0x18] sm:$0xff] (!%p603_p1), %v586_v59 }
 0x25b PF: > { %p869_p2 = scmp.ne.s32.totalorder %s1238_s18, 2 }
 0x25c   : > { %v619_v61 = vlaneseq (!%p869_p2) }
 0x25d   : > { %618 = sbr.rel (%p869_p2) target bundleno = 941 (0x3ad), region = 64 }
 0x25e   : > { %v620_v62 = vand.u32 (!%p869_p2), 127, %v619_v61 }
 0x260   : > { %vm621_vm1 = vcmp.lt.s32.totalorder (!%p869_p2), %v620_v62, 8 }
 0x261   : > { %v622_v63 = vsel (!%p869_p2), %vm621_vm1, %v544_v36, -1e+30  ;;  %v624_v0 = vsel (!%p869_p2), %vm621_vm1, %v552_v34, -1e+30  ;;  %v623_v1 = vsel (!%p869_p2), %vm621_vm1, %v547_v40, -1e+30 }
 0x262   : > { %630 = vmax.xlane.f32.xlu0 (!%p869_p2), %v622_v63  ;;  %634 = vmax.xlane.f32.xlu1 (!%p869_p2), %v624_v0  ;;  %v625_v2 = vsel (!%p869_p2), %vm621_vm1, %v555_v38, -1e+30  ;;  %v626_v3 = vsel (!%p869_p2), %vm621_vm1, %v560_v50, -1e+30  ;;  %v627_v4 = vsel (!%p869_p2), %vm621_vm1, %v563_v54, -1e+30 }
 0x263   : > { %v628_v5 = vsel (!%p869_p2), %vm621_vm1, %v568_v48, -1e+30  ;;  %v629_v6 = vsel (!%p869_p2), %vm621_vm1, %v571_v52, -1e+30 }
 0x266   : > { %632 = vmax.xlane.f32.xlu0 %v623_v1  ;;  %636 = vmax.xlane.f32.xlu1 %v625_v2 }
 0x26a   : > { %638 = vmax.xlane.f32.xlu0 %v626_v3  ;;  %640 = vmax.xlane.f32.xlu1 %v627_v4 }
 0x26e   : > { %642 = vmax.xlane.f32.xlu0 %v628_v5  ;;  %644 = vmax.xlane.f32.xlu1 %v629_v6 }
 0x2ef   : > { %v631_v7 = vpop.xlane.xlu0 %630  ;;  %v635_v8 = vpop.xlane.xlu1 %634 }
 0x2f0   : > { %v1505_v9 = vsub.f32 %v622_v63, %v631_v7  ;;  %v1507_v10 = vsub.f32 %v624_v0, %v635_v8 }
 0x2f2   : > { %v654_v11 = vmul.f32 1.442695, %v1505_v9  ;;  %v658_v12 = vmul.f32 1.442695, %v1507_v10 }
 0x2f3   : > { %v633_v13 = vpop.xlane.xlu0 %632  ;;  %v637_v14 = vpop.xlane.xlu1 %636 }
 0x2f4   : > { %1040 = vpow2.f32 %v654_v11  ;;  %v1511_v15 = vsub.f32 %v623_v1, %v633_v13  ;;  %v1513_v16 = vsub.f32 %v625_v2, %v637_v14 }
 0x2f5   : > { %1042 = vpow2.f32 %v658_v12 }
 0x2f6   : > { %v656_v17 = vmul.f32 1.442695, %v1511_v15  ;;  %v660_v18 = vmul.f32 1.442695, %v1513_v16 }
 0x2f7   : > { %v639_v19 = vpop.xlane.xlu0 %638  ;;  %v641_v20 = vpop.xlane.xlu1 %640 }
 0x2f8   : > { %1044 = vpow2.f32 %v656_v17  ;;  %v1517_v21 = vsub.f32 %v626_v3, %v639_v19  ;;  %v1519_v22 = vsub.f32 %v627_v4, %v641_v20 }
 0x2f9   : > { %1046 = vpow2.f32 %v660_v18 }
 0x2fa   : > { %v662_v23 = vmul.f32 1.442695, %v1517_v21  ;;  %v664_v24 = vmul.f32 1.442695, %v1519_v22 }
 0x2fb   : > { %v643_v25 = vpop.xlane.xlu0 %642  ;;  %v645_v26 = vpop.xlane.xlu1 %644 }
 0x2fc   : > { %1048 = vpow2.f32 %v662_v23  ;;  %v1523_v27 = vsub.f32 %v628_v5, %v643_v25  ;;  %v1525_v28 = vsub.f32 %v629_v6, %v645_v26 }
 0x2fd   : > { %1050 = vpow2.f32 %v664_v24 }
 0x2fe   : > { %v1041_v29 = vpop.eup %1040  ;;  %v666_v30 = vmul.f32 1.442695, %v1523_v27  ;;  %v668_v31 = vmul.f32 1.442695, %v1525_v28 }
 0x2ff   : > { %670 = vadd.xlane.f32.xlu0 %v1041_v29  ;;  %v1043_v32 = vpop.eup %1042 }
 0x300   : > { %1052 = vpow2.f32 %v666_v30 }
 0x301   : > { %1054 = vpow2.f32 %v668_v31 }
 0x302   : > { %v1045_v33 = vpop.eup %1044 }
 0x303   : > { %674 = vadd.xlane.f32.xlu0 %v1043_v32  ;;  %672 = vadd.xlane.f32.xlu1 %v1045_v33  ;;  %v1047_v34 = vpop.eup %1046 }
 0x306   : > { %v1049_v35 = vpop.eup %1048 }
 0x307   : > { %676 = vadd.xlane.f32.xlu1 %v1047_v34  ;;  %678 = vadd.xlane.f32.xlu0 %v1049_v35  ;;  %v1051_v36 = vpop.eup %1050 }
 0x30a   : > { %v1053_v37 = vpop.eup %1052 }
 0x30b   : > { %680 = vadd.xlane.f32.xlu1 %v1051_v36  ;;  %682 = vadd.xlane.f32.xlu0 %v1053_v37  ;;  %v1055_v38 = vpop.eup %1054 }
 0x30f   : > { %684 = vadd.xlane.f32.xlu1 %v1055_v38 }
 0x38c   : > { %v671_v39 = vpop.xlane.xlu0 %670 }
 0x38d   : > { %1056 = vlog2.f32 %v671_v39 }
 0x390   : > { %v673_v40 = vpop.xlane.xlu1 %672  ;;  %v675_v41 = vpop.xlane.xlu0 %674 }
 0x391   : > { %1058 = vlog2.f32 %v673_v40 }
 0x392   : > { %1060 = vlog2.f32 %v675_v41 }
 0x394   : > { %v677_v42 = vpop.xlane.xlu1 %676  ;;  %v679_v43 = vpop.xlane.xlu0 %678 }
 0x395   : > { %1062 = vlog2.f32 %v677_v42 }
 0x396   : > { %1064 = vlog2.f32 %v679_v43 }
 0x397   : > { %v1057_v44 = vpop.eup %1056 }
 0x398   : > { %v687_v45 = vmul.f32 0.6931472, %v1057_v44  ;;  %v681_v46 = vpop.xlane.xlu1 %680  ;;  %v683_v47 = vpop.xlane.xlu0 %682 }
 0x399   : > { %1066 = vlog2.f32 %v681_v46 }
 0x39a   : > { %v702_v48 = vsub.f32 %v1505_v9, %v687_v45  ;;  %1068 = vlog2.f32 %v683_v47 }
 0x39b   : > { %v1059_v49 = vpop.eup %1058 }
 0x39c   : > { %v1061_v50 = vpop.eup %1060  ;;  %710 = vst [vmem:[#allocation9] sm:$0xff] %v702_v48  ;;  %v689_v51 = vmul.f32 0.6931472, %v1059_v49  ;;  %v685_v52 = vpop.xlane.xlu1 %684 }
 0x39d   : > { %v691_v53 = vmul.f32 0.6931472, %v1061_v50  ;;  %1070 = vlog2.f32 %v685_v52 }
 0x39e   : > { %v703_v54 = vsub.f32 %v1511_v15, %v689_v51 }
 0x39f   : > { %v1063_v55 = vpop.eup %1062  ;;  %v704_v56 = vsub.f32 %v1507_v10, %v691_v53 }
 0x3a0   : > { %v1065_v57 = vpop.eup %1064  ;;  %711 = vst [vmem:[#allocation9 + $0x8] sm:$0xff] %v703_v54  ;;  %v693_v58 = vmul.f32 0.6931472, %v1063_v55 }
 0x3a1   : > { %712 = vst [vmem:[#allocation9 + $0x10] sm:$0xff] %v704_v56  ;;  %v695_v59 = vmul.f32 0.6931472, %v1065_v57 }
 0x3a2   : > { %v705_v60 = vsub.f32 %v1513_v16, %v693_v58 }
 0x3a3   : > { %v1067_v61 = vpop.eup %1066  ;;  %v706_v62 = vsub.f32 %v1517_v21, %v695_v59 }
 0x3a4   : > { %v1069_v63 = vpop.eup %1068  ;;  %713 = vst [vmem:[#allocation9 + $0x18] sm:$0xff] %v705_v60  ;;  %v697_v0 = vmul.f32 0.6931472, %v1067_v61 }
 0x3a5   : > { %714 = vst [vmem:[#allocation9 + $0x20] sm:$0xff] %v706_v62  ;;  %v699_v1 = vmul.f32 0.6931472, %v1069_v63 }
 0x3a6   : > { %v707_v2 = vsub.f32 %v1519_v22, %v697_v0 }
 0x3a7   : > { %v1071_v3 = vpop.eup %1070  ;;  %v708_v4 = vsub.f32 %v1523_v27, %v699_v1 }
 0x3a8   : > { %715 = vst [vmem:[#allocation9 + $0x28] sm:$0xff] %v707_v2  ;;  %v701_v5 = vmul.f32 0.6931472, %v1071_v3 }
 0x3a9   : > { %716 = vst [vmem:[#allocation9 + $0x30] sm:$0xff] %v708_v4 }
 0x3aa   : > { %v709_v6 = vsub.f32 %v1525_v28, %v701_v5 }
 0x3ac   : > { %717 = vst [vmem:[#allocation9 + $0x38] sm:$0xff] %v709_v6 }
 0x3ad PF: > { %p967_p8 = scmp.eq.s32.totalorder %s1310_s21, 2  ;;  %s1253_s18 = smov [#allocation9]  }
 0x3ae   : > { %s727_s27 = sshll.u32 %s1253_s18, 4  ;;  %s728_s27 = int_to_ptr.vmem [resolvable:$true] %s727_s27 }
 0x3af   : > { %s1158_s10 = scalar_lea.vmem %s728_s27, 1024  ;;  %p1165_p6 = scmp.lt.s32.totalorder %s728_s27, %s728_s27 }
 0x3b0   : > { %p1159_p13 = scmp.ne.s32.totalorder %s728_s27, %s1158_s10  ;;  %p1166_p7 = scmp.lt.s32.totalorder %s1158_s10, %s1158_s10 }
 0x3b2   : > { %p1160_p4 = pnand %p1159_p13, %p967_p8  ;;  %p1167_p9 = por %p1166_p7, %p1165_p6 }
 0x3b4   : > { %p1161_p5 = pneg %p1160_p4 }
 0x3b6   : > { %p1168_p11 = pnand %p1167_p9, %p1161_p5 }
 0x3b8   : > { %1171 = shalt.err (!%p1168_p11)
}
 0x3b9   : > { %s1172_s6 = scalar_lea.hbm %s1582_s4, 1024 }
 0x3ba   : > { %p1173_p0 = scmp.ne.s32.totalorder %s1582_s4, %s1172_s6  ;;  %p1178_p12 = scmp.lt.u32.totalorder %s1172_s6, %s1582_s4 }
 0x3bc   : > { %p1174_p3 = pnand %p1173_p0, %p967_p8 }
 0x3be   : > { %p1175_p10 = pneg %p1174_p3 }
 0x3c0   : > { %p1180_p1 = pnand %p1178_p12, %p1175_p10 }
 0x3c2   : > { %1183 = shalt.err (!%p1180_p1)
}
 0x3c3   : > { %s1254_s22 = smov 128   ;;  %s1255_s28 = smov 8  }
 0x3c4   : > { %948 = dma.vmem_to_hbm [thread:$0]  (%p967_p8), %s728_s27, 1024, %s1582_s4, [#allocation5], %s1254_s22, %s1254_s22, %s1255_s28  }
 0x3c5   : > { %1221 = dma.done.wait (%p967_p8), [#allocation5], 1024  }
 0x3c6   : > { %1223 = vsyncadd (%p967_p8), [#allocation5], 4294966272 }
 0x3c7 PF: > { %s17_s20 = sadd.s32 1, %s1246_s20   ;;  %s1599_s15 = smov %s1230_s16 }
 0x3c8   : > { %p14_p2 = scmp.ge.s32.totalorder %s17_s20, 5   ;;  %s1600_s16 = smov %s1234_s17 }
 0x3c9   : > { %s1601_s17 = smov %s1405_s25  ;;  %s1602_s18 = smov %s1242_s19 }
 0x3ca   : > { %s1603_s19 = smov %s1605_s12  ;;  %16 = sbr.rel (!%p14_p2) target bundleno = 5 (0x5), region = 104 }
 0x3d1   :  { %743 = vsyncpa [#allocation4], 1 }
 0x3d2   :  { %745 = vsyncpa [#allocation4 + $0x1], 1 }
 0x3d3   :  { %746 = vsyncpa [#allocation7], 1 }
 0x3d4   :  { %747 = vsyncpa [#allocation5], 1 }
 0x3d5   :  { %749 = vsyncpa [#allocation5 + $0x1], 1 }

</bundles_post_ra>
